<compile_context>
chip_gen: v5e
topology: v5e:2x2
jax: 0.10.0
libtpu: 0.0.40
codegen_flags: <defaults>
</compile_context>

<pallas_src>
import functools

import jax
import jax.numpy as jnp
from jax import lax
from jax.experimental import pallas as pl
from jax.experimental.pallas import tpu as pltpu


# ----------------------------------------------------------------------------
# Fused kernel: conv-as-matmul + BN batch stats + affine + ReLU + NCHW write.
# ----------------------------------------------------------------------------
def _fused_conv_bn_relu_kernel(pt_ref, w_ref, g_ref, b_ref, o_ref, *,
                               n_images, hw, eps):
    # pt_ref: (9*Cin, N*H*W)  im2col patches, K-major rows      (lane-dense cols)
    # w_ref : (Cout, 9*Cin)   flattened conv weights
    # g_ref : (Cout, 1)       BN gamma
    # b_ref : (Cout, 1)       BN beta
    # o_ref : (N, Cout, H*W)  NCHW output flattened over (H, W) (lane-dense)

    # One MXU matmul for the whole conv (replaces 9 shifted K=Cin dots).
    y = jnp.dot(w_ref[...], pt_ref[...],
                preferred_element_type=jnp.float32)              # (Cout, N*H*W)

    # BatchNorm2d training-mode statistics over (N, H, W) per channel.
    # Two-pass (centered) variance for numerical safety; reductions run on the
    # XLU, rsqrt on the EUP -- both off the VALU critical slot.
    inv_cnt = 1.0 / float(n_images * hw)
    mean = jnp.sum(y, axis=1, keepdims=True) * inv_cnt           # (Cout, 1)
    centered = y - mean
    var = jnp.sum(centered * centered, axis=1, keepdims=True) * inv_cnt
    scale = g_ref[...] * lax.rsqrt(var + eps)                    # (Cout, 1)

    y_act = jnp.maximum(centered * scale + b_ref[...], 0.0)      # (Cout, N*H*W)

    # Write NCHW directly; the column slices start at multiples of H*W (a
    # 128-multiple for these shapes), so these are whole-vreg moves.
    for n in range(n_images):                                    # static unroll (N=2)
        o_ref[n] = y_act[:, n * hw:(n + 1) * hw]


# ----------------------------------------------------------------------------
# Public wrapper (NCHW in / NCHW out, matching the torch module).
# ----------------------------------------------------------------------------
@functools.partial(jax.jit, static_argnames=("eps",))
def conv_block_forward(x_nchw, w_oihw, bias, gamma, beta, eps=1e-5):
    """conv_block.forward: Conv2d(3x3, s1, p1, bias) -> BatchNorm2d (train-mode
    batch statistics, as for a freshly constructed torch module) -> ReLU.

    `bias` is accepted for API parity but not added: a per-channel constant is
    exactly cancelled by the BN mean subtraction and leaves the variance
    unchanged, so the output is mathematically identical.
    """
    del bias
    x = x_nchw.astype(jnp.float32)
    N, Cin, H, W = x.shape
    Cout = w_oihw.shape[0]
    HW = H * W

    # --- im2col (glue, done once; the kernel then does a single matmul) ------
    # Transpose the SMALL input first so the big patch tensor needs no
    # transpose: (Cin, N, H, W) -> 9 taps stacked on axis 0 -> plain reshape.
    xt = jnp.transpose(x, (1, 0, 2, 3))                          # (Cin, N, H, W)
    xp = jnp.pad(xt, ((0, 0), (0, 0), (1, 1), (1, 1)))           # zero pad = 1
    taps = [xp[:, :, ky:ky + H, kx:kx + W]                       # 9 x (Cin,N,H,W)
            for ky in range(3) for kx in range(3)]
    patches_t = jnp.stack(taps, axis=0).reshape(9 * Cin, N * HW)  # (9Cin, N*HW)

    # OIHW -> (Cout, ky, kx, Cin) -> (Cout, 9*Cin), matching the patch K order.
    w_mat = jnp.transpose(w_oihw.astype(jnp.float32),
                          (0, 2, 3, 1)).reshape(Cout, 9 * Cin)
    g2 = gamma.astype(jnp.float32).reshape(Cout, 1)
    b2 = beta.astype(jnp.float32).reshape(Cout, 1)

    kernel = functools.partial(_fused_conv_bn_relu_kernel,
                               n_images=N, hw=HW, eps=float(eps))
    vmem = pl.BlockSpec(memory_space=pltpu.MemorySpace.VMEM)
    out = pl.pallas_call(
        kernel,
        out_shape=jax.ShapeDtypeStruct((N, Cout, HW), jnp.float32),
        in_specs=[vmem, vmem, vmem, vmem],
        out_specs=vmem,
    )(patches_t, w_mat, g2, b2)

    return out.reshape(N, Cout, H, W)                            # free reshape


# ----------------------------------------------------------------------------
# Pure-JAX reference (includes the conv bias) for validation.
# ----------------------------------------------------------------------------
def _reference(x_nchw, w_oihw, bias, gamma, beta, eps=1e-5):
    x_nhwc = jnp.transpose(x_nchw, (0, 2, 3, 1))
    w_hwio = jnp.transpose(w_oihw, (2, 3, 1, 0))
    y = lax.conv_general_dilated(
        x_nhwc, w_hwio, window_strides=(1, 1), padding="SAME",
        dimension_numbers=("NHWC", "HWIO", "NHWC")) + bias
    mean = jnp.mean(y, axis=(0, 1, 2))
    var = jnp.mean(jnp.square(y - mean), axis=(0, 1, 2))
    yhat = (y - mean) * lax.rsqrt(var + eps) * gamma + beta
    out = jnp.maximum(yhat, 0.0)
    return jnp.transpose(out, (0, 3, 1, 2))


if __name__ == "__main__":
    # Small shapes consistent with conv_block(in_features=4, out_features=8).
    N, Cin, H, W = 2, 4, 16, 16
    Cout = 8

    key = jax.random.PRNGKey(0)
    kx_, kw_, kb_, kg_, kbe_ = jax.random.split(key, 5)

    x = jax.random.normal(kx_, (N, Cin, H, W), jnp.float32)
    w = jax.random.normal(kw_, (Cout, Cin, 3, 3), jnp.float32) * 0.1   # OIHW
    b = jax.random.normal(kb_, (Cout,), jnp.float32) * 0.1             # conv bias
    gamma = 1.0 + 0.1 * jax.random.normal(kg_, (Cout,), jnp.float32)   # BN weight
    beta = 0.1 * jax.random.normal(kbe_, (Cout,), jnp.float32)         # BN bias

    out = conv_block_forward(x, w, b, gamma, beta)
    out = jax.block_until_ready(out)

    ref = _reference(x, w, b, gamma, beta)
    assert out.shape == (N, Cout, H, W)
    assert jnp.allclose(out, ref, atol=1e-4, rtol=1e-4), "mismatch vs reference"

    print("KERNEL_OK")
</pallas_src>

<mosaic_0001>
module attributes {stable_mosaic.version = 11 : i64} {
  func.func @_fused_conv_bn_relu_kernel(%arg0: memref<36x512xf32, #tpu.memory_space<vmem>>, %arg1: memref<8x36xf32, #tpu.memory_space<vmem>>, %arg2: memref<8x1xf32, #tpu.memory_space<vmem>>, %arg3: memref<8x1xf32, #tpu.memory_space<vmem>>, %arg4: memref<2x8x256xf32, #tpu.memory_space<vmem>>) attributes {dimension_semantics = [], scalar_prefetch = 0 : i64, scratch_operands = 0 : i64, tpu.core_type = #tpu.core_type<tc>} {
    %c0 = arith.constant 0 : index
    %c0_0 = arith.constant 0 : index
    %0 = vector.load %arg1[%c0, %c0_0] : memref<8x36xf32, #tpu.memory_space<vmem>>, vector<8x36xf32>
    %c0_1 = arith.constant 0 : index
    %c0_2 = arith.constant 0 : index
    %1 = vector.load %arg0[%c0_1, %c0_2] : memref<36x512xf32, #tpu.memory_space<vmem>>, vector<36x512xf32>
    %cst = arith.constant dense<0.000000e+00> : vector<8x512xf32>
    %2 = tpu.matmul %0, %1, %cst {dimension_numbers = #tpu.dot_dimension_numbers<[1], [0], [0], [1], [0, 0, 1, 1], [], []>} : vector<8x36xf32>, vector<36x512xf32>, vector<8x512xf32> -> vector<8x512xf32>
    %cst_3 = arith.constant dense<0.000000e+00> : vector<8xf32>
    %3 = vector.multi_reduction <add>, %2, %cst_3 [1] : vector<8x512xf32> to vector<8xf32>
    %4 = vector.shape_cast %3 : vector<8xf32> to vector<8x1xf32>
    %cst_4 = arith.constant 0.001953125 : f32
    %5 = vector.broadcast %cst_4 : f32 to vector<8x1xf32>
    %6 = arith.mulf %4, %5 : vector<8x1xf32>
    %7 = vector.broadcast %6 : vector<8x1xf32> to vector<8x512xf32>
    %8 = arith.subf %2, %7 : vector<8x512xf32>
    %9 = arith.mulf %8, %8 : vector<8x512xf32>
    %cst_5 = arith.constant dense<0.000000e+00> : vector<8xf32>
    %10 = vector.multi_reduction <add>, %9, %cst_5 [1] : vector<8x512xf32> to vector<8xf32>
    %11 = vector.shape_cast %10 : vector<8xf32> to vector<8x1xf32>
    %cst_6 = arith.constant 0.001953125 : f32
    %12 = vector.broadcast %cst_6 : f32 to vector<8x1xf32>
    %13 = arith.mulf %11, %12 : vector<8x1xf32>
    %c0_7 = arith.constant 0 : index
    %c0_8 = arith.constant 0 : index
    %14 = vector.load %arg2[%c0_7, %c0_8] : memref<8x1xf32, #tpu.memory_space<vmem>>, vector<8x1xf32>
    %cst_9 = arith.constant 9.99999974E-6 : f32
    %15 = vector.broadcast %cst_9 : f32 to vector<8x1xf32>
    %16 = arith.addf %13, %15 : vector<8x1xf32>
    %17 = math.rsqrt %16 : vector<8x1xf32>
    %18 = arith.mulf %14, %17 : vector<8x1xf32>
    %19 = vector.broadcast %18 : vector<8x1xf32> to vector<8x512xf32>
    %20 = arith.mulf %8, %19 : vector<8x512xf32>
    %c0_10 = arith.constant 0 : index
    %c0_11 = arith.constant 0 : index
    %21 = vector.load %arg3[%c0_10, %c0_11] : memref<8x1xf32, #tpu.memory_space<vmem>>, vector<8x1xf32>
    %22 = vector.broadcast %21 : vector<8x1xf32> to vector<8x512xf32>
    %23 = arith.addf %20, %22 : vector<8x512xf32>
    %cst_12 = arith.constant 0.000000e+00 : f32
    %24 = vector.broadcast %cst_12 : f32 to vector<8x512xf32>
    %25 = arith.maximumf %23, %24 : vector<8x512xf32>
    %26 = vector.extract_strided_slice %25 {offsets = [0, 0], sizes = [8, 256], strides = [1, 1]} : vector<8x512xf32> to vector<8x256xf32>
    %c0_13 = arith.constant 0 : index
    %c0_14 = arith.constant 0 : index
    %c0_15 = arith.constant 0 : index
    %27 = vector.load %arg4[%c0_13, %c0_14, %c0_15] : memref<2x8x256xf32, #tpu.memory_space<vmem>>, vector<1x8x256xf32>
    %28 = vector.shape_cast %27 : vector<1x8x256xf32> to vector<8x256xf32>
    %29 = vector.shape_cast %26 : vector<8x256xf32> to vector<1x8x256xf32>
    tpu.vector_store %arg4[%c0_13, %c0_14, %c0_15], %29 {strides = array<i32>} : memref<2x8x256xf32, #tpu.memory_space<vmem>>, vector<1x8x256xf32>,
    %30 = vector.extract_strided_slice %25 {offsets = [0, 256], sizes = [8, 256], strides = [1, 1]} : vector<8x512xf32> to vector<8x256xf32>
    %c1 = arith.constant 1 : index
    %c0_16 = arith.constant 0 : index
    %c0_17 = arith.constant 0 : index
    %31 = vector.load %arg4[%c1, %c0_16, %c0_17] : memref<2x8x256xf32, #tpu.memory_space<vmem>>, vector<1x8x256xf32>
    %32 = vector.shape_cast %31 : vector<1x8x256xf32> to vector<8x256xf32>
    %33 = vector.shape_cast %30 : vector<8x256xf32> to vector<1x8x256xf32>
    tpu.vector_store %arg4[%c1, %c0_16, %c0_17], %33 {strides = array<i32>} : memref<2x8x256xf32, #tpu.memory_space<vmem>>, vector<1x8x256xf32>,
    return
  }
}

</mosaic_0001>

<bundles_post_ra>
// kernel: conv_block_forward.1
= control target key start
LH: loop header
LB: loop body
LE: loop exit
PB: predicated region body
PF: predicated region fallthrough
CT: control target
= control target key end

     0   :  { %vm42_vm0 = vcmask 1043456   ;;  %vm38_vm1 = vcmask 293888   ;;  %v215_v41 = vmov 0   ;;  %s322_s0 = inlined_call_operand.vmem [shape: f32[36,512], index: 0, kind: input, shape index: {}]   ;;  %s323_s1 = inlined_call_operand.vmem [shape: f32[8,36], index: 1, kind: input, shape index: {}]   ;;  %s324_s2 = inlined_call_operand.vmem [shape: f32[8,1], index: 2, kind: input, shape index: {}]   ;;  %s325_s3 = inlined_call_operand.vmem [shape: f32[8,1], index: 3, kind: input, shape index: {}]   ;;  %s326_s4 = inlined_call_operand.vmem [shape: f32[2,8,256], index: 4, kind: output, shape index: {}]  }
   0x1   :  { %v36_v0 = vld [vmem:[%s322_s0 + $0x90] sm:$0xf]  ;;  %v37_v2 = vld [vmem:[%s322_s0 + $0x98] sm:$0xf]  ;;  %v34_v3 = vld [vmem:[%s322_s0 + $0x80] sm:$0xf]  ;;  %211 = vset.pattern.permute.xlu1 %v215_v41  ;;  %212 = vset.pattern.permute.xlu0 %v215_v41 }
   0x2   :  { %v32_v1 = vld [vmem:[%s322_s0 + $0x70] sm:$0xff]  ;;  %204 = vmatpush.msk.msra.mxu2 %vm42_vm0, %v36_v0  ;;  %206 = vmatpush.msk.msra.mxu3 %vm42_vm0, %v37_v2  ;;  %v35_v4 = vld [vmem:[%s322_s0 + $0x88] sm:$0xf]  ;;  %v33_v6 = vld [vmem:[%s322_s0 + $0x78] sm:$0xff] }
   0x3   :  { %v28_v5 = vld [vmem:[%s322_s0 + $0x50] sm:$0xff]  ;;  %200 = vmatpush.msk.msra.mxu0 %vm42_vm0, %v34_v3  ;;  %202 = vmatpush.msk.msra.mxu1 %vm42_vm0, %v35_v4  ;;  %v30_v7 = vld [vmem:[%s322_s0 + $0x60] sm:$0xff]  ;;  %v31_v8 = vld [vmem:[%s322_s0 + $0x68] sm:$0xff] }
   0x4   :  { %107 = vmatpush.msra.mxu2 %v32_v1  ;;  %127 = vmatpush.msra.mxu3 %v33_v6  ;;  %v29_v9 = vld [vmem:[%s322_s0 + $0x58] sm:$0xff]  ;;  %v26_v10 = vld [vmem:[%s322_s0 + $0x40] sm:$0xff]  ;;  %v24_v11 = vld [vmem:[%s322_s0 + $0x30] sm:$0xff] }
   0x5   :  { %67 = vmatpush.msra.mxu0 %v30_v7  ;;  %87 = vmatpush.msra.mxu1 %v31_v8  ;;  %v27_v12 = vld [vmem:[%s322_s0 + $0x48] sm:$0xff]  ;;  %v25_v13 = vld [vmem:[%s322_s0 + $0x38] sm:$0xff]  ;;  %v22_v14 = vld [vmem:[%s322_s0 + $0x20] sm:$0xff] }
   0x6   :  { %108 = vmatpush.msra.mxu2 %v28_v5  ;;  %128 = vmatpush.msra.mxu3 %v29_v9  ;;  %v23_v15 = vld [vmem:[%s322_s0 + $0x28] sm:$0xff]  ;;  %v20_v16 = vld [vmem:[%s322_s0 + $0x10] sm:$0xff]  ;;  %v21_v17 = vld [vmem:[%s322_s0 + $0x18] sm:$0xff] }
   0x7   :  { %68 = vmatpush.msra.mxu0 %v26_v10  ;;  %88 = vmatpush.msra.mxu1 %v27_v12  ;;  %v17_v18 = vld [vmem:[%s323_s1] sm:$0xff]  ;;  %v19_v20 = vld [vmem:[%s322_s0 + $0x8] sm:$0xff] }
   0x8   :  { %109 = vmatpush.msra.mxu2 %v24_v11  ;;  %129 = vmatpush.msra.mxu3 %v25_v13  ;;  %v18_v19 = vld [vmem:[%s322_s0] sm:$0xff] }
   0x9   :  { %69 = vmatpush.msra.mxu0 %v22_v14  ;;  %89 = vmatpush.msra.mxu1 %v23_v15  ;;  %v155_v50 = vld [vmem:[%s324_s2] sm:$0xff] }
   0xa   :  { %110 = vmatpush.msra.mxu2 %v20_v16  ;;  %130 = vmatpush.msra.mxu3 %v21_v17  ;;  %v177_v54 = vld [vmem:[%s325_s3] sm:$0xff] }
   0xb   :  { %205 = vmatmul.msk.f32.vlgmr.msra.gmra.mxu2 %vm38_vm1, %v17_v18  ;;  %207 = vmatmul.msk.f32.vlgmr.msra.gmra.mxu3 %vm38_vm1, %v17_v18 }
   0xc   :  { %70 = vmatpush.msra.mxu0 %v18_v19  ;;  %90 = vmatpush.msra.mxu1 %v19_v20 }
   0xd   :  { %201 = vmatmul.msk.f32.vlgmr.msra.gmra.mxu0 %vm38_vm1, %v17_v18  ;;  %203 = vmatmul.msk.f32.vlgmr.msra.gmra.mxu1 %vm38_vm1, %v17_v18 }
  0x8a   :  { %v72_v21 = vpop.f32.mrf.mxu0  ;;  %v92_v22 = vpop.f32.mrf.mxu1 }
  0x8b   :  { %v135_v23 = vadd.f32 %v92_v22, %v72_v21 }
  0x8e   :  { %v112_v24 = vpop.f32.mrf.mxu2  ;;  %v132_v25 = vpop.f32.mrf.mxu3 }
  0x8f   :  { %v136_v26 = vadd.f32 %v135_v23, %v112_v24 }
  0x91   :  { %v137_v27 = vadd.f32 %v136_v26, %v132_v25 }
  0x93   :  { %138 = vadd.xlane.f32.xlu0 %v137_v27 }
 0x106   :  { %v139_v28 = vpop.xlane.xlu0 %138 }
 0x107   :  { %v140_v29 = vmul.f32 0.001953125, %v139_v28 }
 0x109   :  { %v141_v30 = vsub.f32 %v72_v21, %v140_v29  ;;  %v142_v31 = vsub.f32 %v92_v22, %v140_v29  ;;  %v143_v32 = vsub.f32 %v112_v24, %v140_v29  ;;  %v144_v33 = vsub.f32 %v132_v25, %v140_v29 }
 0x10b   :  { %v145_v34 = vmul.f32 %v141_v30, %v141_v30  ;;  %v146_v35 = vmul.f32 %v142_v31, %v142_v31  ;;  %v147_v36 = vmul.f32 %v143_v32, %v143_v32  ;;  %v148_v38 = vmul.f32 %v144_v33, %v144_v33 }
 0x10d   :  { %v149_v37 = vadd.f32 %v146_v35, %v145_v34 }
 0x10f   :  { %v150_v39 = vadd.f32 %v149_v37, %v147_v36 }
 0x111   :  { %v151_v40 = vadd.f32 %v150_v39, %v148_v38 }
 0x113   :  { %152 = vadd.xlane.f32.xlu0 %v151_v40 }
 0x186   :  { %v153_v42 = vpop.xlane.xlu0 %152 }
 0x187   :  { %v154_v43 = vmul.f32 0.001953125, %v153_v42 }
 0x189   :  { %v156_v44 = vadd.f32 1e-05, %v154_v43 }
 0x18b   :  { %213 = vrsqrt.f32 %v156_v44  ;;  %vm163_vm3 = vweird.f32 %v156_v44 }
 0x191   :  { %v214_v45 = vpop.eup %213 }
 0x192   :  { %v158_v46 = vmul.f32 %v214_v45, %v156_v44  ;;  %vm164_vm2 = vweird.f32 %v214_v45 }
 0x193   :  { %vm165_vm4 = vmor %vm163_vm3, %vm164_vm2 }
 0x194   :  { %v159_v47 = vmul.f32 %v214_v45, %v158_v46 }
 0x196   :  { %v160_v48 = vmul.f32 0.5, %v159_v47 }
 0x198   :  { %v161_v49 = vsub.f32 1.5, %v160_v48 }
 0x19a   :  { %v162_v51 = vmul.f32 %v214_v45, %v161_v49 }
 0x19c   :  { %v166_v52 = vsel %vm165_vm4, %v214_v45, %v162_v51 }
 0x19d   :  { %v167_v53 = vmul.f32 %v166_v52, %v155_v50 }
 0x19f   :  { %170 = vperm.xlu1 %211, %v167_v53  }
 0x1a7   :  { %180 = vperm.xlu1 %211, %v177_v54  }
 0x211   :  { %v171_v55 = vpop.permute.xlu1 %170 }
 0x212   :  { %v173_v56 = vmul.f32 %v171_v55, %v141_v30  ;;  %v174_v57 = vmul.f32 %v171_v55, %v142_v31  ;;  %v175_v58 = vmul.f32 %v171_v55, %v143_v32  ;;  %v176_v59 = vmul.f32 %v171_v55, %v144_v33 }
 0x219   :  { %v181_v60 = vpop.permute.xlu1 %180 }
 0x21a   :  { %v183_v61 = vadd.f32 %v181_v60, %v173_v56  ;;  %v184_v62 = vadd.f32 %v181_v60, %v174_v57  ;;  %v185_v63 = vadd.f32 %v181_v60, %v175_v58  ;;  %v186_v0 = vadd.f32 %v181_v60, %v176_v59 }
 0x21c   :  { %v187_v1 = vmax.f32 %v183_v61, 0.0  ;;  %v188_v2 = vmax.f32 %v184_v62, 0.0  ;;  %v189_v3 = vmax.f32 %v185_v63, 0.0  ;;  %v190_v4 = vmax.f32 %v186_v0, 0.0 }
 0x21e   :  { %191 = vst [vmem:[%s326_s4] sm:$0xff] %v187_v1 }
 0x21f   :  { %192 = vst [vmem:[%s326_s4 + $0x8] sm:$0xff] %v188_v2 }
 0x220   :  { %208 = vst [vmem:[%s326_s4 + $0x10] sm:$0xff] %v189_v3 }
 0x221   :  { %209 = vst [vmem:[%s326_s4 + $0x18] sm:$0xff] %v190_v4 }

</bundles_post_ra>
